<compile_context>
chip_gen: v7x
topology: tpu7x:2x2x1
jax: 0.10.0
libtpu: 0.0.40
codegen_flags: <defaults>
</compile_context>

<pallas_src>
import math
import numpy as np

import jax
import jax.numpy as jnp
from jax.experimental import pallas as pl
from jax.experimental.pallas import tpu as pltpu

WINDOW_SIZE = 11
SIGMA = 1.5
PAD = WINDOW_SIZE // 2
C1 = 0.01 ** 2
C2 = 0.03 ** 2


def _gaussian_1d(window_size=WINDOW_SIZE, sigma=SIGMA):
    # Same construction as pytorch_ssim: normalized 1D gaussian.
    g = np.array(
        [math.exp(-((x - window_size // 2) ** 2) / (2.0 * sigma ** 2))
         for x in range(window_size)], dtype=np.float64)
    return (g / g.sum()).astype(np.float32)


def _round_up(x, m):
    return (x + m - 1) // m * m


def _band_matrices(H, W, Hp_al, Wp, b_tile):
    """Banded Toeplitz matrices for the separable 11-tap Gaussian conv.

    Row pass : R   = X_flat (B*Hp_al, Wp) @ T_row (Wp, W)
    Col pass : out = L_bd   (B*H, B*Hp_al) @ R    (B*Hp_al, W)
    with L_bd = kron(I_B, L_col).  Result equals conv2d(X_b, gauss_11x11,
    padding=5) for every un-padded HxW image of the tile, stacked along rows.
    """
    g = _gaussian_1d()
    t_row = np.zeros((Wp, W), np.float32)
    for x in range(W):
        t_row[x:x + WINDOW_SIZE, x] = g
    l_col = np.zeros((H, Hp_al), np.float32)
    for y in range(H):
        l_col[y, y:y + WINDOW_SIZE] = g
    l_bd = np.kron(np.eye(b_tile, dtype=np.float32), l_col)
    return t_row, l_bd


def _make_kernel(B_TILE, H, W, Hp_al, Wp, use_edges):
    def kernel(trow_ref, lbd_ref, yt_ref, yp_ref, m_ref, out_ref):
        m = m_ref[...]                         # (B, Hp_al, Wp), 0/1; 0 in halo
        s1_3d = yp_ref[...] * m                # masked y_pred  (SSIM img1)
        s2_3d = yt_ref[...] * m                # masked y_true  (SSIM img2)
        # Hp_al % 8 == 0 -> layout-preserving reshape (no relayout copy).
        s1 = s1_3d.reshape(B_TILE * Hp_al, Wp)
        s2 = s2_3d.reshape(B_TILE * Hp_al, Wp)

        # ---- l_depth partial: zero-padded halo contributes |0-0| = 0 -------
        out_ref[0, 0] = jnp.sum(jnp.abs(s1 - s2))

        # ---- l_edges partial (only traced when w2 != 0) ---------------------
        if use_edges:
            p = s1_3d[:, PAD:PAD + H, PAD:PAD + W]
            t = s2_3d[:, PAD:PAD + H, PAD:PAD + W]
            dxp = p[:, :, 1:] - p[:, :, :-1]
            dxt = t[:, :, 1:] - t[:, :, :-1]
            dyp = p[:, 1:, :] - p[:, :-1, :]
            dyt = t[:, 1:, :] - t[:, :-1, :]
            out_ref[0, 1] = (jnp.sum(jnp.abs(dxp - dxt))
                             + jnp.sum(jnp.abs(dyp - dyt)))
        else:
            out_ref[0, 1] = jnp.float32(0.0)

        # ---- SSIM: separable Gaussian conv == two banded matmuls (MXU) -----
        trow = trow_ref[...]                   # (Wp, W)            row band
        lbd = lbd_ref[...]                     # (B*H, B*Hp_al)     block-diag col band

        def sep_conv(x2d):                     # (B*Hp_al, Wp) -> (B*H, W)
            r = jnp.dot(x2d, trow, preferred_element_type=jnp.float32)
            return jnp.dot(lbd, r, preferred_element_type=jnp.float32)

        mu1 = sep_conv(s1)
        mu2 = sep_conv(s2)
        e11 = sep_conv(s1 * s1)
        e22 = sep_conv(s2 * s2)
        e12 = sep_conv(s1 * s2)

        mu1_sq = mu1 * mu1
        mu2_sq = mu2 * mu2
        mu1mu2 = mu1 * mu2
        sig1 = e11 - mu1_sq
        sig2 = e22 - mu2_sq
        sig12 = e12 - mu1mu2
        num = (2.0 * mu1mu2 + C1) * (2.0 * sig12 + C2)
        den = (mu1_sq + mu2_sq + C1) * (sig1 + sig2 + C2)
        out_ref[0, 2] = jnp.sum(num * pl.reciprocal(den, approx=True))

    return kernel


def masked_depth_loss(y_true, y_pred, mask, w1=1.0, w2=0.0, w3=0.1):
    """Pallas implementation of Masked_depthLoss.forward (returns a scalar)."""
    N, Cc, H, W = y_true.shape
    NB = N * Cc
    Hp, Wp = H + 2 * PAD, W + 2 * PAD
    Hp_al = _round_up(Hp, 8)                  # sublane-aligned padded height

    # Images per grid step: target a modest per-step footprint, keep the
    # block-diagonal column band small, never exceed the batch.
    per_img_bytes = Hp_al * Wp * 4
    B_TILE = int(max(1, min(NB, 8, (2 << 20) // per_img_bytes)))
    while B_TILE > 1 and (B_TILE * H) * (B_TILE * Hp_al) * 4 > (2 << 20):
        B_TILE -= 1
    NB_pad = _round_up(NB, B_TILE)
    num_steps = NB_pad // B_TILE

    # TODO(synk): for production-size depth maps, build the 5-px halo in-kernel
    # (H-strip tiling with a 10-row halo) instead of this wrapper-side jnp.pad,
    # saving one extra HBM round trip of all three inputs.
    def prep(x):
        x = x.astype(jnp.float32).reshape(NB, H, W)
        return jnp.pad(x, ((0, NB_pad - NB),
                           (PAD, PAD + (Hp_al - Hp)),
                           (PAD, PAD)))

    yt_p = prep(y_true)
    yp_p = prep(y_pred)
    m_p = prep(mask.astype(jnp.float32))      # halo & dummy images -> mask 0

    t_row_np, l_bd_np = _band_matrices(H, W, Hp_al, Wp, B_TILE)
    t_row = jnp.asarray(t_row_np)
    l_bd = jnp.asarray(l_bd_np)

    kernel = _make_kernel(B_TILE, H, W, Hp_al, Wp, use_edges=(w2 != 0.0))

    img_spec = pl.BlockSpec((B_TILE, Hp_al, Wp), lambda s: (s, 0, 0))

    blk_bytes = B_TILE * Hp_al * Wp * 4
    band_bytes = (Wp * W + (B_TILE * H) * (B_TILE * Hp_al)) * 4
    vmem_need = 3 * 2 * blk_bytes + 2 * band_bytes + 14 * blk_bytes
    vmem_limit = int(min(64 << 20, max(16 << 20, 4 * vmem_need)))

    partials = pl.pallas_call(
        kernel,
        out_shape=jax.ShapeDtypeStruct((num_steps, 3), jnp.float32),
        grid_spec=pltpu.PrefetchScalarGridSpec(
            num_scalar_prefetch=0,
            grid=(num_steps,),
            in_specs=[
                pl.BlockSpec((Wp, W), lambda s: (0, 0)),                        # row band
                pl.BlockSpec((B_TILE * H, B_TILE * Hp_al), lambda s: (0, 0)),   # col band
                img_spec, img_spec, img_spec,
            ],
            out_specs=pl.BlockSpec((1, 3), lambda s: (s, 0),
                                   memory_space=pltpu.SMEM),
        ),
        compiler_params=pltpu.CompilerParams(
            dimension_semantics=("parallel",),   # no cross-step state
            vmem_limit_bytes=vmem_limit),
    )(t_row, l_bd, yt_p, yp_p, m_p)

    sums = jnp.sum(partials, axis=0)             # (3,)
    total = float(NB * H * W)
    # Dummy (all-zero, zero-mask) batch-pad images contribute exactly
    # ssim_map == 1 per pixel and 0 to the other two sums -> exact compensation.
    ssim_sum = sums[2] - float((NB_pad - NB) * H * W)

    l_depth = sums[0] / total
    l_edges = sums[1] / total
    ssim_val = ssim_sum / total
    l_ssim = jnp.clip((1.0 - ssim_val) * 0.5, 0.0, 1.0)

    loss = w1 * l_ssim + w3 * l_depth
    if w2 != 0.0:
        loss = loss + w2 * l_edges
    return loss


def _reference_loss(y_true, y_pred, mask, w1=1.0, w2=0.0, w3=0.1):
    """Pure-JAX (non-Pallas) mirror of the PyTorch module, for self-check."""
    mt = mask.astype(jnp.float32)
    p = y_pred.astype(jnp.float32) * mt
    t = y_true.astype(jnp.float32) * mt
    N, C, H, W = p.shape
    total = N * C * H * W

    l_depth = jnp.sum(jnp.abs(p - t)) / total

    dxp = p[:, :, :, 1:] - p[:, :, :, :-1]
    dxt = t[:, :, :, 1:] - t[:, :, :, :-1]
    dyp = p[:, :, 1:, :] - p[:, :, :-1, :]
    dyt = t[:, :, 1:, :] - t[:, :, :-1, :]
    l_edges = (jnp.sum(jnp.abs(dxp - dxt)) + jnp.sum(jnp.abs(dyp - dyt))) / total

    g = _gaussian_1d()
    win = np.outer(g, g)
    pp = jnp.pad(p, ((0, 0), (0, 0), (PAD, PAD), (PAD, PAD)))
    tp = jnp.pad(t, ((0, 0), (0, 0), (PAD, PAD), (PAD, PAD)))
    mu1 = jnp.zeros_like(p); mu2 = jnp.zeros_like(p)
    e11 = jnp.zeros_like(p); e22 = jnp.zeros_like(p); e12 = jnp.zeros_like(p)
    for i in range(WINDOW_SIZE):
        for j in range(WINDOW_SIZE):
            wij = float(win[i, j])
            a = pp[:, :, i:i + H, j:j + W]
            b = tp[:, :, i:i + H, j:j + W]
            mu1 = mu1 + wij * a
            mu2 = mu2 + wij * b
            e11 = e11 + wij * a * a
            e22 = e22 + wij * b * b
            e12 = e12 + wij * a * b
    mu1_sq, mu2_sq, mu1mu2 = mu1 * mu1, mu2 * mu2, mu1 * mu2
    s1 = e11 - mu1_sq; s2 = e22 - mu2_sq; s12 = e12 - mu1mu2
    ssim_map = ((2 * mu1mu2 + C1) * (2 * s12 + C2)) / (
        (mu1_sq + mu2_sq + C1) * (s1 + s2 + C2))
    l_ssim = jnp.clip((1.0 - jnp.mean(ssim_map)) * 0.5, 0.0, 1.0)
    return w1 * l_ssim + w2 * l_edges + w3 * l_depth


if __name__ == "__main__":
    root_key = jax.random.PRNGKey(0)

    def run_case(N, Cc, H, W, w1, w2, w3, key):
        k1, k2, k3 = jax.random.split(key, 3)
        y_true = jax.random.uniform(k1, (N, Cc, H, W), jnp.float32, 0.1, 10.0)
        y_pred = jax.random.uniform(k2, (N, Cc, H, W), jnp.float32, 0.1, 10.0)
        mask = jax.random.uniform(k3, (N, Cc, H, W)) > 0.3   # bool lidar mask

        loss = masked_depth_loss(y_true, y_pred, mask, w1, w2, w3)
        jax.block_until_ready(loss)

        ref = _reference_loss(y_true, y_pred, mask, w1, w2, w3)
        if not np.allclose(np.asarray(loss), np.asarray(ref),
                           rtol=1e-2, atol=1e-2):
            raise AssertionError(
                f"mismatch at {(N, Cc, H, W, w1, w2, w3)}: "
                f"pallas={float(loss):.6f} ref={float(ref):.6f}")

    keys = jax.random.split(root_key, 3)
    run_case(2, 1, 16, 16, 1.0, 0.0, 0.1, keys[0])   # defaults, single step
    run_case(9, 1, 16, 16, 1.0, 0.0, 0.1, keys[1])   # multi-step grid + batch pad
    run_case(2, 1, 16, 16, 1.0, 0.5, 0.1, keys[2])   # gradient (l_edges) path
    print("KERNEL_OK")
</pallas_src>

<mosaic_0001>
module attributes {stable_mosaic.version = 11 : i64} {
  func.func @kernel(%arg0: i32, %arg1: memref<26x16xf32, #tpu.memory_space<vmem>>, %arg2: memref<32x64xf32, #tpu.memory_space<vmem>>, %arg3: memref<2x32x26xf32, #tpu.memory_space<vmem>>, %arg4: memref<2x32x26xf32, #tpu.memory_space<vmem>>, %arg5: memref<2x32x26xf32, #tpu.memory_space<vmem>>, %arg6: memref<1x3xf32, #tpu.memory_space<smem>>) attributes {dimension_semantics = [#tpu.dimension_semantics<parallel>], iteration_bounds = array<i64: 1>, scalar_prefetch = 0 : i64, scratch_operands = 0 : i64, tpu.core_type = #tpu.core_type<tc>, window_params = [{pipeline_mode = #tpu.pipeline_mode<synchronous>, transform_indices = @transform_0, window_bounds = array<i64: 26, 16>}, {pipeline_mode = #tpu.pipeline_mode<synchronous>, transform_indices = @transform_1, window_bounds = array<i64: 32, 64>}, {transform_indices = @transform_2, window_bounds = array<i64: 2, 32, 26>}, {transform_indices = @transform_3, window_bounds = array<i64: 2, 32, 26>}, {transform_indices = @transform_4, window_bounds = array<i64: 2, 32, 26>}, {transform_indices = @transform_5, window_bounds = array<i64: 1, 3>}]} {
    %c0 = arith.constant 0 : index
    %c0_0 = arith.constant 0 : index
    %c0_1 = arith.constant 0 : index
    %0 = vector.load %arg5[%c0, %c0_0, %c0_1] : memref<2x32x26xf32, #tpu.memory_space<vmem>>, vector<2x32x26xf32>
    %c0_2 = arith.constant 0 : index
    %c0_3 = arith.constant 0 : index
    %c0_4 = arith.constant 0 : index
    %1 = vector.load %arg4[%c0_2, %c0_3, %c0_4] : memref<2x32x26xf32, #tpu.memory_space<vmem>>, vector<2x32x26xf32>
    %2 = arith.mulf %1, %0 : vector<2x32x26xf32>
    %c0_5 = arith.constant 0 : index
    %c0_6 = arith.constant 0 : index
    %c0_7 = arith.constant 0 : index
    %3 = vector.load %arg3[%c0_5, %c0_6, %c0_7] : memref<2x32x26xf32, #tpu.memory_space<vmem>>, vector<2x32x26xf32>
    %4 = arith.mulf %3, %0 : vector<2x32x26xf32>
    %5 = vector.shape_cast %2 : vector<2x32x26xf32> to vector<64x26xf32>
    %6 = vector.shape_cast %4 : vector<2x32x26xf32> to vector<64x26xf32>
    %7 = arith.subf %5, %6 : vector<64x26xf32>
    %8 = math.absf %7 : vector<64x26xf32>
    %9 = vector.shape_cast %8 : vector<64x26xf32> to vector<1x64x26xf32>
    %cst = arith.constant dense<0.000000e+00> : vector<1xf32>
    %10 = vector.multi_reduction <add>, %9, %cst [1, 2] : vector<1x64x26xf32> to vector<1xf32>
    %11 = vector.shape_cast %10 : vector<1xf32> to vector<1x1x1xf32>
    %12 = vector.extract %11[0, 0, 0] : f32 from vector<1x1x1xf32>
    %c0_8 = arith.constant 0 : index
    %c0_9 = arith.constant 0 : index
    %13 = memref.load %arg6[%c0_8, %c0_9] : memref<1x3xf32, #tpu.memory_space<smem>>
    memref.store %12, %arg6[%c0_8, %c0_9] : memref<1x3xf32, #tpu.memory_space<smem>>
    %cst_10 = arith.constant 0.000000e+00 : f32
    %c0_11 = arith.constant 0 : index
    %c1 = arith.constant 1 : index
    %14 = memref.load %arg6[%c0_11, %c1] : memref<1x3xf32, #tpu.memory_space<smem>>
    memref.store %cst_10, %arg6[%c0_11, %c1] : memref<1x3xf32, #tpu.memory_space<smem>>
    %c0_12 = arith.constant 0 : index
    %c0_13 = arith.constant 0 : index
    %15 = vector.load %arg1[%c0_12, %c0_13] : memref<26x16xf32, #tpu.memory_space<vmem>>, vector<26x16xf32>
    %c0_14 = arith.constant 0 : index
    %c0_15 = arith.constant 0 : index
    %16 = vector.load %arg2[%c0_14, %c0_15] : memref<32x64xf32, #tpu.memory_space<vmem>>, vector<32x64xf32>
    %cst_16 = arith.constant dense<0.000000e+00> : vector<64x16xf32>
    %17 = tpu.matmul %5, %15, %cst_16 {dimension_numbers = #tpu.dot_dimension_numbers<[1], [0], [0], [1], [0, 0, 1, 1], [], []>} : vector<64x26xf32>, vector<26x16xf32>, vector<64x16xf32> -> vector<64x16xf32>
    %cst_17 = arith.constant dense<0.000000e+00> : vector<32x16xf32>
    %18 = tpu.matmul %16, %17, %cst_17 {dimension_numbers = #tpu.dot_dimension_numbers<[1], [0], [0], [1], [0, 0, 1, 1], [], []>} : vector<32x64xf32>, vector<64x16xf32>, vector<32x16xf32> -> vector<32x16xf32>
    %cst_18 = arith.constant dense<0.000000e+00> : vector<64x16xf32>
    %19 = tpu.matmul %6, %15, %cst_18 {dimension_numbers = #tpu.dot_dimension_numbers<[1], [0], [0], [1], [0, 0, 1, 1], [], []>} : vector<64x26xf32>, vector<26x16xf32>, vector<64x16xf32> -> vector<64x16xf32>
    %cst_19 = arith.constant dense<0.000000e+00> : vector<32x16xf32>
    %20 = tpu.matmul %16, %19, %cst_19 {dimension_numbers = #tpu.dot_dimension_numbers<[1], [0], [0], [1], [0, 0, 1, 1], [], []>} : vector<32x64xf32>, vector<64x16xf32>, vector<32x16xf32> -> vector<32x16xf32>
    %21 = arith.mulf %5, %5 : vector<64x26xf32>
    %cst_20 = arith.constant dense<0.000000e+00> : vector<64x16xf32>
    %22 = tpu.matmul %21, %15, %cst_20 {dimension_numbers = #tpu.dot_dimension_numbers<[1], [0], [0], [1], [0, 0, 1, 1], [], []>} : vector<64x26xf32>, vector<26x16xf32>, vector<64x16xf32> -> vector<64x16xf32>
    %cst_21 = arith.constant dense<0.000000e+00> : vector<32x16xf32>
    %23 = tpu.matmul %16, %22, %cst_21 {dimension_numbers = #tpu.dot_dimension_numbers<[1], [0], [0], [1], [0, 0, 1, 1], [], []>} : vector<32x64xf32>, vector<64x16xf32>, vector<32x16xf32> -> vector<32x16xf32>
    %24 = arith.mulf %6, %6 : vector<64x26xf32>
    %cst_22 = arith.constant dense<0.000000e+00> : vector<64x16xf32>
    %25 = tpu.matmul %24, %15, %cst_22 {dimension_numbers = #tpu.dot_dimension_numbers<[1], [0], [0], [1], [0, 0, 1, 1], [], []>} : vector<64x26xf32>, vector<26x16xf32>, vector<64x16xf32> -> vector<64x16xf32>
    %cst_23 = arith.constant dense<0.000000e+00> : vector<32x16xf32>
    %26 = tpu.matmul %16, %25, %cst_23 {dimension_numbers = #tpu.dot_dimension_numbers<[1], [0], [0], [1], [0, 0, 1, 1], [], []>} : vector<32x64xf32>, vector<64x16xf32>, vector<32x16xf32> -> vector<32x16xf32>
    %27 = arith.mulf %5, %6 : vector<64x26xf32>
    %cst_24 = arith.constant dense<0.000000e+00> : vector<64x16xf32>
    %28 = tpu.matmul %27, %15, %cst_24 {dimension_numbers = #tpu.dot_dimension_numbers<[1], [0], [0], [1], [0, 0, 1, 1], [], []>} : vector<64x26xf32>, vector<26x16xf32>, vector<64x16xf32> -> vector<64x16xf32>
    %cst_25 = arith.constant dense<0.000000e+00> : vector<32x16xf32>
    %29 = tpu.matmul %16, %28, %cst_25 {dimension_numbers = #tpu.dot_dimension_numbers<[1], [0], [0], [1], [0, 0, 1, 1], [], []>} : vector<32x64xf32>, vector<64x16xf32>, vector<32x16xf32> -> vector<32x16xf32>
    %30 = arith.mulf %18, %18 : vector<32x16xf32>
    %31 = arith.mulf %20, %20 : vector<32x16xf32>
    %32 = arith.mulf %18, %20 : vector<32x16xf32>
    %33 = arith.subf %23, %30 : vector<32x16xf32>
    %34 = arith.subf %26, %31 : vector<32x16xf32>
    %35 = arith.subf %29, %32 : vector<32x16xf32>
    %cst_26 = arith.constant 2.000000e+00 : f32
    %36 = vector.broadcast %cst_26 : f32 to vector<32x16xf32>
    %37 = arith.mulf %36, %32 : vector<32x16xf32>
    %cst_27 = arith.constant 9.99999974E-5 : f32
    %38 = vector.broadcast %cst_27 : f32 to vector<32x16xf32>
    %39 = arith.addf %37, %38 : vector<32x16xf32>
    %cst_28 = arith.constant 2.000000e+00 : f32
    %40 = vector.broadcast %cst_28 : f32 to vector<32x16xf32>
    %41 = arith.mulf %40, %35 : vector<32x16xf32>
    %cst_29 = arith.constant 8.99999984E-4 : f32
    %42 = vector.broadcast %cst_29 : f32 to vector<32x16xf32>
    %43 = arith.addf %41, %42 : vector<32x16xf32>
    %44 = arith.mulf %39, %43 : vector<32x16xf32>
    %45 = arith.addf %30, %31 : vector<32x16xf32>
    %cst_30 = arith.constant 9.99999974E-5 : f32
    %46 = vector.broadcast %cst_30 : f32 to vector<32x16xf32>
    %47 = arith.addf %45, %46 : vector<32x16xf32>
    %48 = arith.addf %33, %34 : vector<32x16xf32>
    %cst_31 = arith.constant 8.99999984E-4 : f32
    %49 = vector.broadcast %cst_31 : f32 to vector<32x16xf32>
    %50 = arith.addf %48, %49 : vector<32x16xf32>
    %51 = arith.mulf %47, %50 : vector<32x16xf32>
    %52 = tpu.reciprocal %51 {approx = true} : vector<32x16xf32> -> vector<32x16xf32>
    %53 = arith.mulf %44, %52 : vector<32x16xf32>
    %54 = vector.shape_cast %53 : vector<32x16xf32> to vector<1x32x16xf32>
    %cst_32 = arith.constant dense<0.000000e+00> : vector<1xf32>
    %55 = vector.multi_reduction <add>, %54, %cst_32 [1, 2] : vector<1x32x16xf32> to vector<1xf32>
    %56 = vector.shape_cast %55 : vector<1xf32> to vector<1x1x1xf32>
    %57 = vector.extract %56[0, 0, 0] : f32 from vector<1x1x1xf32>
    %c0_33 = arith.constant 0 : index
    %c2 = arith.constant 2 : index
    %58 = memref.load %arg6[%c0_33, %c2] : memref<1x3xf32, #tpu.memory_space<smem>>
    memref.store %57, %arg6[%c0_33, %c2] : memref<1x3xf32, #tpu.memory_space<smem>>
    return
  }
  func.func @transform_0(%arg0: i32) -> (i32, i32) {
    %c0_i32 = arith.constant 0 : i32
    %c0_i32_0 = arith.constant 0 : i32
    %c0_i32_1 = arith.constant 0 : i32
    return %c0_i32, %c0_i32_0 : i32, i32
  }
  func.func @transform_1(%arg0: i32) -> (i32, i32) {
    %c0_i32 = arith.constant 0 : i32
    %c0_i32_0 = arith.constant 0 : i32
    %c0_i32_1 = arith.constant 0 : i32
    return %c0_i32, %c0_i32_0 : i32, i32
  }
  func.func @transform_2(%arg0: i32) -> (i32, i32, i32) {
    %c0_i32 = arith.constant 0 : i32
    %c0_i32_0 = arith.constant 0 : i32
    %c0_i32_1 = arith.constant 0 : i32
    return %arg0, %c0_i32, %c0_i32_0 : i32, i32, i32
  }
  func.func @transform_3(%arg0: i32) -> (i32, i32, i32) {
    %c0_i32 = arith.constant 0 : i32
    %c0_i32_0 = arith.constant 0 : i32
    %c0_i32_1 = arith.constant 0 : i32
    return %arg0, %c0_i32, %c0_i32_0 : i32, i32, i32
  }
  func.func @transform_4(%arg0: i32) -> (i32, i32, i32) {
    %c0_i32 = arith.constant 0 : i32
    %c0_i32_0 = arith.constant 0 : i32
    %c0_i32_1 = arith.constant 0 : i32
    return %arg0, %c0_i32, %c0_i32_0 : i32, i32, i32
  }
  func.func @transform_5(%arg0: i32) -> (i32, i32) {
    %c0_i32 = arith.constant 0 : i32
    %c0_i32_0 = arith.constant 0 : i32
    return %arg0, %c0_i32 : i32, i32
  }
}

</mosaic_0001>

<bundles_post_ra>
// kernel: tpu_custom_call.1
= control target key start
LH: loop header
LB: loop body
LE: loop exit
PB: predicated region body
PF: predicated region fallthrough
CT: control target
= control target key end

     0   :  { %vm138_vm0 = vcmask 1041408   ;;  %vm1881_vm1 = vmmov 1   ;;  %vm77_vm3 = vcmask 211968   ;;  %s2282_s0 = inlined_call_operand.vmem [shape: f32[26,16], index: 0, kind: input, shape index: {}]   ;;  %s2283_s1 = inlined_call_operand.vmem [shape: f32[32,64], index: 1, kind: input, shape index: {}]   ;;  %s2284_s2 = inlined_call_operand.vmem [shape: f32[2,32,26], index: 2, kind: input, shape index: {}]   ;;  %s2285_s3 = inlined_call_operand.vmem [shape: f32[2,32,26], index: 3, kind: input, shape index: {}]   ;;  %s2286_s4 = inlined_call_operand.vmem [shape: f32[2,32,26], index: 4, kind: input, shape index: {}]   ;;  %s2287_s5 = inlined_call_operand.hbm [shape: f32[1,3], index: 5, kind: output, shape index: {}]  }
   0x1   :  { %v106_v0 = vld [vmem:[%s2282_s0] sm:$0xff]  ;;  %v107_v1 = vld [vmem:[%s2282_s0 + $0x8] sm:$0xff]  ;;  %v108_v2 = vld [vmem:[%s2282_s0 + $0x10] sm:$0xff] }
   0x2   :  { %v1923_v3 = vpack.c.bf16 %v107_v1, %v106_v0  ;;  %v109_v4 = vld [vmem:[%s2282_s0 + $0x18] sm:$0x3]  ;;  %v21_v5 = vld [vmem:[%s2286_s4] sm:$0xff]  ;;  %vm1933_vm2 = vmpackc.low %vm138_vm0, %vm1881_vm1 }
   0x3   :  { %v1931_v6 = vpack.c.bf16 %v109_v4, %v108_v2  ;;  %v29_v8 = vld [vmem:[%s2285_s3] sm:$0xff]  ;;  %v22_v10 = vld [vmem:[%s2286_s4 + $0x8] sm:$0xff]  ;;  %v23_v12 = vld [vmem:[%s2286_s4 + $0x10] sm:$0xff] }
   0x4   :  { %1725 = vmatprep.subr.bf16.mxu0 %v1923_v3  ;;  %v1941_v9 = vmul.f32 %v29_v8, %v21_v5  ;;  %v30_v11 = vld [vmem:[%s2285_s3 + $0x8] sm:$0xff]  ;;  %v31_v13 = vld [vmem:[%s2285_s3 + $0x10] sm:$0xff]  ;;  %v24_v16 = vld [vmem:[%s2286_s4 + $0x18] sm:$0xff] }
   0x5   :  { %1727 = vmatpush3.bf16.msra.mxu0 %v1923_v3  ;;  %v1961_v14 = vmul.f32 %v30_v11, %v22_v10  ;;  %v1966_v15 = vmul.f32 %v31_v13, %v23_v12  ;;  %v32_v17 = vld [vmem:[%s2285_s3 + $0x18] sm:$0xff]  ;;  %v25_v18 = vld [vmem:[%s2286_s4 + $0x20] sm:$0xff] }
   0x6   :  { %1730 = vmatprep.subr.msk.bf16.mxu0 %vm1933_vm2, %v1931_v6  ;;  %1522 = vmatprep.mubr.msk.f32.mxu0 %vm77_vm3, %v1941_v9  ;;  %v33_v19 = vld [vmem:[%s2285_s3 + $0x20] sm:$0xff] }
   0x9   :  { %1733 = vmatpush3.bf16.msk.msra.mxu0 %vm1933_vm2, %v1931_v6 }
   0xa   :  { %1751 = vmatprep.subr.bf16.mxu0 %v1923_v3 }
   0xb   :  { %10 = vsyncpa [#allocation3], 0  ;;  %v1983_v20 = vmul.f32 %v32_v17, %v24_v16  ;;  %v1988_v21 = vmul.f32 %v33_v19, %v25_v18  ;;  %v26_v22 = vld [vmem:[%s2286_s4 + $0x28] sm:$0xff]  ;;  %v27_v24 = vld [vmem:[%s2286_s4 + $0x30] sm:$0xff]  ;;  %v559_v47 = vmul.f32 %v1941_v9, %v1941_v9  ;;  %v560_v48 = vmul.f32 %v1961_v14, %v1961_v14  ;;  %s1882_s27 = smov 0.0   ;;  %s1869_s30 = scalar_lea.hbm %s2287_s5, 16 }
   0xc   :  { %1523 = vmatmul.mubr.msk.f32.vlgmr.msra.gmra.mrb[0].mxu0 %vm77_vm3, %v1961_v14  ;;  %v34_v23 = vld [vmem:[%s2285_s3 + $0x28] sm:$0xff]  ;;  %v35_v25 = vld [vmem:[%s2285_s3 + $0x30] sm:$0xff]  ;;  %v28_v28 = vld [vmem:[%s2286_s4 + $0x38] sm:$0xff]  ;;  %v561_v49 = vmul.f32 %v1966_v15, %v1966_v15  ;;  %vm247_vm4 = vcmask 523264   ;;  %vm1297_vm5 = vcmask 130048   ;;  %105 = sst [smem:[#allocation2 + $0x1]] %s1882_s27  ;;  %p1870_p0 = scmp.ne.s32.totalorder %s2287_s5, %s1869_s30 }
   0xd   :  { %1753 = vmatpush3.bf16.msra.mxu0 %v1923_v3  ;;  %1525 = vmatprep.mubr.msk.f32.mxu0 %vm77_vm3, %v1966_v15  ;;  %v2007_v26 = vmul.f32 %v34_v23, %v26_v22  ;;  %v2014_v27 = vmul.f32 %v35_v25, %v27_v24  ;;  %v36_v29 = vld [vmem:[%s2285_s3 + $0x38] sm:$0xff]  ;;  %v45_v30 = vld [vmem:[%s2284_s2] sm:$0xff]  ;;  %v46_v32 = vld [vmem:[%s2284_s2 + $0x8] sm:$0xff]  ;;  %v562_v50 = vmul.f32 %v1983_v20, %v1983_v20  ;;  %p1873_p1 = scmp.lt.u32.totalorder %s1869_s30, %s2287_s5 }
   0xe   :  { %1756 = vmatprep.subr.msk.bf16.mxu0 %vm1933_vm2, %v1931_v6  ;;  %v2028_v31 = vmul.f32 %v36_v29, %v28_v28  ;;  %v2035_v33 = vmul.f32 %v45_v30, %v21_v5  ;;  %v47_v34 = vld [vmem:[%s2284_s2 + $0x10] sm:$0xff]  ;;  %v2040_v35 = vmul.f32 %v46_v32, %v22_v10  ;;  %v48_v37 = vld [vmem:[%s2284_s2 + $0x18] sm:$0xff]  ;;  %v49_v38 = vld [vmem:[%s2284_s2 + $0x20] sm:$0xff]  ;;  %v563_v51 = vmul.f32 %v1988_v21, %v1988_v21 }
   0xf   :  { %v2046_v36 = vmul.f32 %v47_v34, %v23_v12  ;;  %v2056_v39 = vmul.f32 %v48_v37, %v24_v16  ;;  %v2061_v40 = vmul.f32 %v49_v38, %v25_v18  ;;  %v50_v41 = vld [vmem:[%s2284_s2 + $0x28] sm:$0xff]  ;;  %v51_v42 = vld [vmem:[%s2284_s2 + $0x30] sm:$0xff]  ;;  %v52_v45 = vld [vmem:[%s2284_s2 + $0x38] sm:$0xff]  ;;  %v564_v52 = vmul.f32 %v2007_v26, %v2007_v26  ;;  %p1875_p2 = pnand %p1873_p1, %p1870_p0 }
  0x10   :  { %1526 = vmatmul.mubr.msk.f32.gmra.mrb[2].mxu0 %vm77_vm3, %v1983_v20  ;;  %v2074_v43 = vmul.f32 %v50_v41, %v26_v22  ;;  %v2081_v44 = vmul.f32 %v51_v42, %v27_v24  ;;  %v2089_v46 = vmul.f32 %v52_v45, %v28_v28  ;;  %v565_v53 = vmul.f32 %v2014_v27, %v2014_v27  ;;  %v2185_v7 = vld [vmem:[%s2283_s1] sm:$0xff]  ;;  %v2192_v29 = vld [vmem:[%s2283_s1 + $0x8] sm:$0xff]  ;;  %v2197_v32 = vld [vmem:[%s2283_s1 + $0x10] sm:$0xff] }
  0x11   :  { %1528 = vmatprep.mubr.msk.f32.mxu0 %vm77_vm3, %v1988_v21  ;;  %1759 = vmatpush3.bf16.msk.msra.mxu0 %vm1933_vm2, %v1931_v6  ;;  %v566_v54 = vmul.f32 %v2028_v31, %v2028_v31  ;;  %v781_v55 = vmul.f32 %v2035_v33, %v2035_v33  ;;  %v782_v56 = vmul.f32 %v2040_v35, %v2040_v35  ;;  %v2206_v38 = vld [vmem:[%s2283_s1 + $0x18] sm:$0xff] }
  0x12   :  { %1777 = vmatprep.subr.bf16.mxu0 %v1923_v3  ;;  %v783_v57 = vmul.f32 %v2046_v36, %v2046_v36  ;;  %v784_v58 = vmul.f32 %v2056_v39, %v2056_v39  ;;  %v785_v59 = vmul.f32 %v2061_v40, %v2061_v40  ;;  %v786_v60 = vmul.f32 %v2074_v43, %v2074_v43 }
  0x13   :  { %v787_v61 = vmul.f32 %v2081_v44, %v2081_v44  ;;  %v788_v62 = vmul.f32 %v2089_v46, %v2089_v46  ;;  %v1003_v63 = vmul.f32 %v2035_v33, %v1941_v9  ;;  %v1004_v0 = vmul.f32 %v2040_v35, %v1961_v14  ;;  %1550 = vmatprep.mubr.msk.f32.mxu1 %vm247_vm4, %v2185_v7 }
  0x14   :  { %1529 = vmatmul.mubr.msk.f32.gmra.mrb[4].mxu0 %vm77_vm3, %v2007_v26  ;;  %v1005_v1 = vmul.f32 %v2046_v36, %v1966_v15  ;;  %v1006_v2 = vmul.f32 %v2056_v39, %v1983_v20  ;;  %v1008_v4 = vmul.f32 %v2074_v43, %v2007_v26  ;;  %v1009_v5 = vmul.f32 %v2081_v44, %v2014_v27 }
  0x15   :  { %1531 = vmatprep.mubr.msk.f32.mxu0 %vm77_vm3, %v2014_v27 }
  0x18   :  { %1532 = vmatmul.mubr.msk.f32.gmra.mrb[6].mxu0 %vm77_vm3, %v2028_v31 }
  0x19   :  { %1564 = vmatprep.mubr.msk.f32.mxu0 %vm77_vm3, %v2035_v33 }
  0x1c   :  { %1565 = vmatmul.mubr.msk.f32.vlgmr.msra.gmra.mrb[8].mxu0 %vm77_vm3, %v2040_v35 }
  0x1d   :  { %1779 = vmatpush3.bf16.msra.mxu0 %v1923_v3  ;;  %1567 = vmatprep.mubr.msk.f32.mxu0 %vm77_vm3, %v2046_v36 }
  0x1e   :  { %1782 = vmatprep.subr.msk.bf16.mxu0 %vm1933_vm2, %v1931_v6 }
  0x20   :  { %1568 = vmatmul.mubr.msk.f32.gmra.mrb[10].mxu0 %vm77_vm3, %v2056_v39 }
  0x21   :  { %1570 = vmatprep.mubr.msk.f32.mxu0 %vm77_vm3, %v2061_v40  ;;  %1785 = vmatpush3.bf16.msk.msra.mxu0 %vm1933_vm2, %v1931_v6 }
  0x22   :  { %1803 = vmatprep.subr.bf16.mxu0 %v1923_v3 }
  0x24   :  { %1571 = vmatmul.mubr.msk.f32.gmra.mrb[12].mxu0 %vm77_vm3, %v2074_v43 }
  0x25   :  { %1573 = vmatprep.mubr.msk.f32.mxu0 %vm77_vm3, %v2081_v44 }
  0x28   :  { %1574 = vmatmul.mubr.msk.f32.gmra.mrb[14].mxu0 %vm77_vm3, %v2089_v46 }
  0x29   :  { %1606 = vmatprep.mubr.msk.f32.mxu0 %vm77_vm3, %v559_v47 }
  0x2c   :  { %1607 = vmatmul.mubr.msk.f32.vlgmr.msra.gmra.mrb[16].mxu0 %vm77_vm3, %v560_v48 }
  0x2d   :  { %1805 = vmatpush3.bf16.msra.mxu0 %v1923_v3  ;;  %1609 = vmatprep.mubr.msk.f32.mxu0 %vm77_vm3, %v561_v49 }
  0x2e   :  { %1808 = vmatprep.subr.msk.bf16.mxu0 %vm1933_vm2, %v1931_v6 }
  0x30   :  { %1610 = vmatmul.mubr.msk.f32.gmra.mrb[18].mxu0 %vm77_vm3, %v562_v50 }
  0x31   :  { %1612 = vmatprep.mubr.msk.f32.mxu0 %vm77_vm3, %v563_v51  ;;  %1811 = vmatpush3.bf16.msk.msra.mxu0 %vm1933_vm2, %v1931_v6 }
  0x32   :  { %1829 = vmatprep.subr.bf16.mxu0 %v1923_v3 }
  0x34   :  { %1613 = vmatmul.mubr.msk.f32.gmra.mrb[20].mxu0 %vm77_vm3, %v564_v52 }
  0x35   :  { %1615 = vmatprep.mubr.msk.f32.mxu0 %vm77_vm3, %v565_v53 }
  0x38   :  { %1616 = vmatmul.mubr.msk.f32.gmra.mrb[22].mxu0 %vm77_vm3, %v566_v54 }
  0x39   :  { %1648 = vmatprep.mubr.msk.f32.mxu0 %vm77_vm3, %v781_v55 }
  0x3c   :  { %1649 = vmatmul.mubr.msk.f32.vlgmr.msra.gmra.mrb[24].mxu0 %vm77_vm3, %v782_v56 }
  0x3d   :  { %1831 = vmatpush3.bf16.msra.mxu0 %v1923_v3  ;;  %1651 = vmatprep.mubr.msk.f32.mxu0 %vm77_vm3, %v783_v57  ;;  %v1007_v3 = vmul.f32 %v2061_v40, %v1988_v21 }
  0x3e   :  { %1834 = vmatprep.subr.msk.bf16.mxu0 %vm1933_vm2, %v1931_v6 }
  0x40   :  { %1652 = vmatmul.mubr.msk.f32.gmra.mrb[26].mxu0 %vm77_vm3, %v784_v58 }
  0x41   :  { %1654 = vmatprep.mubr.msk.f32.mxu0 %vm77_vm3, %v785_v59  ;;  %1837 = vmatpush3.bf16.msk.msra.mxu0 %vm1933_vm2, %v1931_v6  ;;  %v1010_v6 = vmul.f32 %v2089_v46, %v2028_v31 }
  0x44   :  { %1655 = vmatmul.mubr.msk.f32.gmra.mrb[28].mxu0 %vm77_vm3, %v786_v60 }
  0x45   :  { %1657 = vmatprep.mubr.msk.f32.mxu0 %vm77_vm3, %v787_v61 }
  0x48   :  { %1658 = vmatmul.mubr.msk.f32.gmra.mrb[30].mxu0 %vm77_vm3, %v788_v62 }
  0x49   :  { %1690 = vmatprep.mubr.msk.f32.mxu0 %vm77_vm3, %v1003_v63 }
  0x4c   :  { %1691 = vmatmul.mubr.msk.f32.vlgmr.msra.gmra.mrb[32].mxu0 %vm77_vm3, %v1004_v0 }
  0x4d   :  { %1693 = vmatprep.mubr.msk.f32.mxu0 %vm77_vm3, %v1005_v1 }
  0x50   :  { %1694 = vmatmul.mubr.msk.f32.gmra.mrb[34].mxu0 %vm77_vm3, %v1006_v2 }
  0x51   :  { %1696 = vmatprep.mubr.msk.f32.mxu0 %vm77_vm3, %v1007_v3 }
  0x54   :  { %1697 = vmatmul.mubr.msk.f32.gmra.mrb[36].mxu0 %vm77_vm3, %v1008_v4 }
  0x55   :  { %1699 = vmatprep.mubr.msk.f32.mxu0 %vm77_vm3, %v1009_v5 }
  0x58   :  { %1700 = vmatmul.mubr.msk.f32.gmra.mrb[38].mxu0 %vm77_vm3, %v1010_v6 }
  0xdf   :  { %v1524_v8 = vpop.f32.mrb[0].mxu0 }
  0xe0   :  { %v208_v10 = vpop.f32.mrb[1].mxu0 }
  0xe1   :  { %v1734_v11 = vpack.c.bf16 %v1524_v8, %v208_v10 }
  0xe3   :  { %v1527_v12 = vpop.f32.mrb[2].mxu0  ;;  %1735 = vmatprep.subr.bf16.mxu1 %v1734_v11 }
  0xe4   :  { %v218_v13 = vpop.f32.mrb[3].mxu0  ;;  %1737 = vmatpush3.bf16.msra.mxu1 %v1734_v11 }
  0xe5   :  { %v1738_v16 = vpack.c.bf16 %v1527_v12, %v218_v13 }
  0xe7   :  { %v1530_v17 = vpop.f32.mrb[4].mxu0  ;;  %1739 = vmatprep.subr.bf16.mxu1 %v1738_v16 }
  0xe8   :  { %v228_v18 = vpop.f32.mrb[5].mxu0  ;;  %1741 = vmatpush3.bf16.msra.mxu1 %v1738_v16 }
  0xe9   :  { %v1742_v19 = vpack.c.bf16 %v1530_v17, %v228_v18 }
  0xeb   :  { %v1533_v22 = vpop.f32.mrb[6].mxu0  ;;  %1743 = vmatprep.subr.bf16.mxu1 %v1742_v19 }
  0xec   :  { %v238_v23 = vpop.f32.mrb[7].mxu0  ;;  %1745 = vmatpush3.bf16.msra.mxu1 %v1742_v19 }
  0xed   :  { %v1746_v24 = vpack.c.bf16 %v1533_v22, %v238_v23 }
  0xef   :  { %1747 = vmatprep.subr.bf16.mxu1 %v1746_v24  ;;  %v1566_v25 = vpop.f32.mrb[8].mxu0 }
  0xf0   :  { %1749 = vmatpush3.bf16.msra.mxu1 %v1746_v24  ;;  %v435_v28 = vpop.f32.mrb[9].mxu0 }
  0xf1   :  { %v1760_v30 = vpack.c.bf16 %v1566_v25, %v435_v28 }
  0xf3   :  { %v1569_v34 = vpop.f32.mrb[10].mxu0  ;;  %1761 = vmatprep.subr.bf16.mxu1 %v1760_v30  ;;  %1551 = vmatmul.mubr.msk.f32.vlgmr.msra.gmra.mrb[0].mxu1 %vm247_vm4, %v2192_v29 }
  0xf4   :  { %v445_v37 = vpop.f32.mrb[11].mxu0  ;;  %1763 = vmatpush3.bf16.msra.mxu1 %v1760_v30  ;;  %1553 = vmatprep.mubr.msk.f32.mxu1 %vm247_vm4, %v2197_v32 }
  0xf5   :  { %v1764_v41 = vpack.c.bf16 %v1569_v34, %v445_v37  ;;  %v62_v37 = vsub.f32 %v1961_v14, %v2040_v35 }
  0xf7   :  { %v1572_v42 = vpop.f32.mrb[12].mxu0  ;;  %1765 = vmatprep.subr.bf16.mxu1 %v1764_v41  ;;  %1554 = vmatmul.mubr.msk.f32.gmra.mrb[2].mxu1 %vm247_vm4, %v2206_v38 }
  0xf8   :  { %v455_v45 = vpop.f32.mrb[13].mxu0  ;;  %1767 = vmatpush3.bf16.msra.mxu1 %v1764_v41  ;;  %1592 = vmatprep.mubr.msk.f32.mxu1 %vm247_vm4, %v2185_v7  ;;  %v63_v41 = vsub.f32 %v1966_v15, %v2046_v36  ;;  %v66_v15 = vsub.f32 %v2007_v26, %v2074_v43 }
  0xf9   :  { %v1768_v47 = vpack.c.bf16 %v1572_v42, %v455_v45  ;;  %v70_v45 = vand.u32 2147483647, %v62_v37 }
  0xfb   :  { %v1575_v48 = vpop.f32.mrb[14].mxu0  ;;  %1769 = vmatprep.subr.bf16.mxu1 %v1768_v47 }
  0xfc   :  { %v465_v49 = vpop.f32.mrb[15].mxu0  ;;  %1771 = vmatpush3.bf16.msra.mxu1 %v1768_v47  ;;  %v71_v47 = vand.u32 2147483647, %v63_v41 }
  0xfd   :  { %v1772_v50 = vpack.c.bf16 %v1575_v48, %v465_v49  ;;  %v79_v48 = vsel %vm77_vm3, %v70_v45, 0.0 }
  0xfe   :  { %v81_v14 = vsel %vm77_vm3, %v71_v47, 0.0 }
  0xff   :  { %1773 = vmatprep.subr.bf16.mxu1 %v1772_v50  ;;  %v1608_v51 = vpop.f32.mrb[16].mxu0 }
 0x100   :  { %1775 = vmatpush3.bf16.msra.mxu1 %v1772_v50  ;;  %v657_v52 = vpop.f32.mrb[17].mxu0  ;;  %v74_v50 = vand.u32 2147483647, %v66_v15 }
 0x101   :  { %v1786_v53 = vpack.c.bf16 %v1608_v51, %v657_v52 }
 0x103   :  { %1593 = vmatmul.mubr.msk.f32.vlgmr.msra.gmra.mrb[4].mxu1 %vm247_vm4, %v2192_v29  ;;  %v1611_v54 = vpop.f32.mrb[18].mxu0  ;;  %1787 = vmatprep.subr.bf16.mxu1 %v1786_v53 }
 0x104   :  { %v667_v55 = vpop.f32.mrb[19].mxu0  ;;  %1789 = vmatpush3.bf16.msra.mxu1 %v1786_v53  ;;  %1595 = vmatprep.mubr.msk.f32.mxu1 %vm247_vm4, %v2197_v32  ;;  %v87_v53 = vsel %vm77_vm3, %v74_v50, 0.0 }
 0x105   :  { %v1790_v56 = vpack.c.bf16 %v1611_v54, %v667_v55 }
 0x107   :  { %1596 = vmatmul.mubr.msk.f32.gmra.mrb[6].mxu1 %vm247_vm4, %v2206_v38  ;;  %v1614_v57 = vpop.f32.mrb[20].mxu0  ;;  %1791 = vmatprep.subr.bf16.mxu1 %v1790_v56 }
 0x108   :  { %v677_v58 = vpop.f32.mrb[21].mxu0  ;;  %1793 = vmatpush3.bf16.msra.mxu1 %v1790_v56  ;;  %1634 = vmatprep.mubr.msk.f32.mxu1 %vm247_vm4, %v2185_v7 }
 0x109   :  { %v1794_v59 = vpack.c.bf16 %v1614_v57, %v677_v58 }
 0x10b   :  { %v1617_v60 = vpop.f32.mrb[22].mxu0  ;;  %1795 = vmatprep.subr.bf16.mxu1 %v1794_v59 }
 0x10c   :  { %v687_v61 = vpop.f32.mrb[23].mxu0  ;;  %1797 = vmatpush3.bf16.msra.mxu1 %v1794_v59 }
 0x10d   :  { %v1798_v62 = vpack.c.bf16 %v1617_v60, %v687_v61 }
 0x10f   :  { %1799 = vmatprep.subr.bf16.mxu1 %v1798_v62  ;;  %v1650_v63 = vpop.f32.mrb[24].mxu0 }
 0x110   :  { %1801 = vmatpush3.bf16.msra.mxu1 %v1798_v62  ;;  %v879_v0 = vpop.f32.mrb[25].mxu0 }
 0x111   :  { %v1812_v1 = vpack.c.bf16 %v1650_v63, %v879_v0 }
 0x113   :  { %1635 = vmatmul.mubr.msk.f32.vlgmr.msra.gmra.mrb[8].mxu1 %vm247_vm4, %v2192_v29  ;;  %v1653_v2 = vpop.f32.mrb[26].mxu0  ;;  %1813 = vmatprep.subr.bf16.mxu1 %v1812_v1 }
 0x114   :  { %v889_v3 = vpop.f32.mrb[27].mxu0  ;;  %1815 = vmatpush3.bf16.msra.mxu1 %v1812_v1  ;;  %1637 = vmatprep.mubr.msk.f32.mxu1 %vm247_vm4, %v2197_v32 }
 0x115   :  { %v1816_v4 = vpack.c.bf16 %v1653_v2, %v889_v3 }
 0x117   :  { %1638 = vmatmul.mubr.msk.f32.gmra.mrb[10].mxu1 %vm247_vm4, %v2206_v38  ;;  %v1656_v5 = vpop.f32.mrb[28].mxu0  ;;  %1817 = vmatprep.subr.bf16.mxu1 %v1816_v4 }
 0x118   :  { %v899_v6 = vpop.f32.mrb[29].mxu0  ;;  %1819 = vmatpush3.bf16.msra.mxu1 %v1816_v4  ;;  %1676 = vmatprep.mubr.msk.f32.mxu1 %vm247_vm4, %v2185_v7 }
 0x119   :  { %v1820_v8 = vpack.c.bf16 %v1656_v5, %v899_v6 }
 0x11b   :  { %v1659_v10 = vpop.f32.mrb[30].mxu0  ;;  %1821 = vmatprep.subr.bf16.mxu1 %v1820_v8 }
 0x11c   :  { %v909_v11 = vpop.f32.mrb[31].mxu0  ;;  %1823 = vmatpush3.bf16.msra.mxu1 %v1820_v8 }
 0x11d   :  { %v1824_v12 = vpack.c.bf16 %v1659_v10, %v909_v11 }
 0x11f   :  { %1825 = vmatprep.subr.bf16.mxu1 %v1824_v12  ;;  %v1692_v13 = vpop.f32.mrb[32].mxu0 }
 0x120   :  { %1827 = vmatpush3.bf16.msra.mxu1 %v1824_v12  ;;  %v1101_v16 = vpop.f32.mrb[33].mxu0 }
 0x121   :  { %v1838_v17 = vpack.c.bf16 %v1692_v13, %v1101_v16 }
 0x123   :  { %1677 = vmatmul.mubr.msk.f32.vlgmr.msra.gmra.mrb[12].mxu1 %vm247_vm4, %v2192_v29  ;;  %v1695_v18 = vpop.f32.mrb[34].mxu0  ;;  %1839 = vmatprep.subr.bf16.mxu1 %v1838_v17 }
 0x124   :  { %v1111_v19 = vpop.f32.mrb[35].mxu0  ;;  %1841 = vmatpush3.bf16.msra.mxu1 %v1838_v17  ;;  %1679 = vmatprep.mubr.msk.f32.mxu1 %vm247_vm4, %v2197_v32 }
 0x125   :  { %v1842_v22 = vpack.c.bf16 %v1695_v18, %v1111_v19 }
 0x127   :  { %1680 = vmatmul.mubr.msk.f32.gmra.mrb[14].mxu1 %vm247_vm4, %v2206_v38  ;;  %v1698_v23 = vpop.f32.mrb[36].mxu0  ;;  %1843 = vmatprep.subr.bf16.mxu1 %v1842_v22 }
 0x128   :  { %v1121_v24 = vpop.f32.mrb[37].mxu0  ;;  %1845 = vmatpush3.bf16.msra.mxu1 %v1842_v22  ;;  %1718 = vmatprep.mubr.msk.f32.mxu1 %vm247_vm4, %v2185_v7  ;;  %v61_v7 = vsub.f32 %v1941_v9, %v2035_v33  ;;  %v65_v9 = vsub.f32 %v1988_v21, %v2061_v40  ;;  %v68_v21 = vsub.f32 %v2028_v31, %v2089_v46 }
 0x129   :  { %v1846_v25 = vpack.c.bf16 %v1698_v23, %v1121_v24 }
 0x12a   :  { %v69_v42 = vand.u32 2147483647, %v61_v7  ;;  %v73_v36 = vand.u32 2147483647, %v65_v9  ;;  %v76_v55 = vand.u32 2147483647, %v68_v21 }
 0x12b   :  { %v1701_v28 = vpop.f32.mrb[38].mxu0  ;;  %1847 = vmatprep.subr.bf16.mxu1 %v1846_v25 }
 0x12c   :  { %v1131_v30 = vpop.f32.mrb[39].mxu0  ;;  %1849 = vmatpush3.bf16.msra.mxu1 %v1846_v25  ;;  %v85_v51 = vsel %vm77_vm3, %v73_v36, 0.0  ;;  %v91_v56 = vsel %vm77_vm3, %v76_v55, 0.0 }
 0x12d   :  { %v1850_v34 = vpack.c.bf16 %v1701_v28, %v1131_v30 }
 0x12f   :  { %1851 = vmatprep.subr.bf16.mxu1 %v1850_v34 }
 0x130   :  { %1853 = vmatpush3.bf16.msra.mxu1 %v1850_v34 }
 0x133   :  { %1719 = vmatmul.mubr.msk.f32.vlgmr.msra.gmra.mrb[16].mxu1 %vm247_vm4, %v2192_v29  ;;  %v64_v29 = vsub.f32 %v1983_v20, %v2056_v39  ;;  %v67_v39 = vsub.f32 %v2014_v27, %v2081_v44 }
 0x134   :  { %1721 = vmatprep.mubr.msk.f32.mxu1 %vm247_vm4, %v2197_v32  ;;  %v78_v32 = vsel %vm77_vm3, %v69_v42, 0.0 }
 0x135   :  { %v72_v33 = vand.u32 2147483647, %v64_v29  ;;  %v75_v40 = vand.u32 2147483647, %v67_v39 }
 0x137   :  { %1722 = vmatmul.mubr.msk.f32.gmra.mrb[18].mxu1 %vm247_vm4, %v2206_v38  ;;  %v80_v38 = vadd.f32 %v79_v48, %v78_v32  ;;  %v83_v49 = vsel %vm77_vm3, %v72_v33, 0.0  ;;  %v89_v26 = vsel %vm77_vm3, %v75_v40, 0.0 }
 0x139   :  { %v82_v35 = vadd.f32 %v81_v14, %v80_v38 }
 0x13b   :  { %v84_v20 = vadd.f32 %v83_v49, %v82_v35 }
 0x13d   :  { %v86_v52 = vadd.f32 %v85_v51, %v84_v20 }
 0x13f   :  { %v88_v54 = vadd.f32 %v87_v53, %v86_v52 }
 0x141   :  { %v90_v43 = vadd.f32 %v89_v26, %v88_v54 }
 0x143   :  { %v92_v57 = vadd.f32 %v91_v56, %v90_v43 }
 0x145   :  { %93 = vadd.xlane.f32.xlu0 %v92_v57 }
 0x1c6   :  { %v1552_v27 = vpop.f32.mrb[0].mxu1 }
 0x1c7   :  { %v326_v44 = vpop.f32.mrb[1].mxu1  ;;  %v1226_v61 = vmul.f32 %v1552_v27, %v1552_v27 }
 0x1c8   :  { %v1225_v63 = vmul.f32 %v326_v44, %v326_v44 }
 0x1ca   :  { %v1555_v58 = vpop.f32.mrb[2].mxu1 }
 0x1cb   :  { %v336_v59 = vpop.f32.mrb[3].mxu1  ;;  %v1228_v5 = vmul.f32 %v1555_v58, %v1555_v58 }
 0x1cc   :  { %v1227_v11 = vmul.f32 %v336_v59, %v336_v59 }
 0x1d6   :  { %v1594_v60 = vpop.f32.mrb[4].mxu1 }
 0x1d7   :  { %v1230_v62 = vmul.f32 %v1594_v60, %v1594_v60  ;;  %v1234_v31 = vmul.f32 %v1594_v60, %v1552_v27  ;;  %v540_v46 = vpop.f32.mrb[5].mxu1 }
 0x1d8   :  { %v1229_v0 = vmul.f32 %v540_v46, %v540_v46  ;;  %v1233_v1 = vmul.f32 %v540_v46, %v326_v44 }
 0x1d9   :  { %v1270_v2 = vadd.f32 %v1230_v62, %v1226_v61  ;;  %v1250_v53 = vmul.f32 2.0, %v1234_v31 }
 0x1da   :  { %v1269_v3 = vadd.f32 %v1229_v0, %v1225_v63  ;;  %v1597_v4 = vpop.f32.mrb[6].mxu1  ;;  %v1249_v26 = vmul.f32 2.0, %v1233_v1 }
 0x1db   :  { %v1232_v6 = vmul.f32 %v1597_v4, %v1597_v4  ;;  %v1236_v8 = vmul.f32 %v1597_v4, %v1555_v58  ;;  %v550_v10 = vpop.f32.mrb[7].mxu1  ;;  %v1274_v47 = vadd.f32 0.0001, %v1270_v2  ;;  %v1254_v44 = vadd.f32 0.0001, %v1250_v53 }
 0x1dc   :  { %v1231_v12 = vmul.f32 %v550_v10, %v550_v10  ;;  %v1235_v13 = vmul.f32 %v550_v10, %v336_v59  ;;  %v1273_v9 = vadd.f32 0.0001, %v1269_v3 }
 0x1dd   :  { %v1272_v16 = vadd.f32 %v1232_v6, %v1228_v5  ;;  %v1252_v58 = vmul.f32 2.0, %v1236_v8 }
 0x1de   :  { %v1271_v17 = vadd.f32 %v1231_v12, %v1227_v11  ;;  %v1251_v46 = vmul.f32 2.0, %v1235_v13 }
 0x1df   :  { %v1276_v20 = vadd.f32 0.0001, %v1272_v16 }
 0x1e0   :  { %v1275_v50 = vadd.f32 0.0001, %v1271_v17 }
 0x1e6   :  { %v1636_v18 = vpop.f32.mrb[8].mxu1 }
 0x1e7   :  { %v1238_v19 = vsub.f32 %v1636_v18, %v1226_v61  ;;  %v762_v22 = vpop.f32.mrb[9].mxu1 }
 0x1e8   :  { %v1237_v23 = vsub.f32 %v762_v22, %v1225_v63 }
 0x1ea   :  { %v1639_v24 = vpop.f32.mrb[10].mxu1 }
 0x1eb   :  { %v1240_v25 = vsub.f32 %v1639_v24, %v1228_v5  ;;  %v772_v28 = vpop.f32.mrb[11].mxu1 }
 0x1ec   :  { %v1239_v30 = vsub.f32 %v772_v28, %v1227_v11 }
 0x1f6   :  { %v1678_v34 = vpop.f32.mrb[12].mxu1 }
 0x1f7   :  { %v1242_v7 = vsub.f32 %v1678_v34, %v1230_v62  ;;  %v984_v37 = vpop.f32.mrb[13].mxu1  ;;  %v1253_v62 = vadd.f32 0.0001, %v1249_v26 }
 0x1f8   :  { %v1241_v41 = vsub.f32 %v984_v37, %v1229_v0 }
 0x1f9   :  { %v1278_v42 = vadd.f32 %v1242_v7, %v1238_v19 }
 0x1fa   :  { %v1277_v45 = vadd.f32 %v1241_v41, %v1237_v23  ;;  %v1681_v29 = vpop.f32.mrb[14].mxu1  ;;  %v94_v41 = vpop.xlane.xlu0 %93 }
 0x1fb   :  { %v1282_v32 = vadd.f32 0.0009, %v1278_v42  ;;  %v1244_v48 = vsub.f32 %v1681_v29, %v1232_v6  ;;  %v994_v38 = vpop.f32.mrb[15].mxu1  ;;  %v1256_v6 = vadd.f32 0.0001, %v1252_v58  ;;  %v95_v42 = vrot.slane %v94_v41, 4 }
 0x1fc   :  { %v1281_v33 = vadd.f32 0.0009, %v1277_v45  ;;  %v1243_v14 = vsub.f32 %v994_v38, %v1231_v12  ;;  %v1255_v12 = vadd.f32 0.0001, %v1251_v46 }
 0x1fd   :  { %v1286_v35 = vmul.f32 %v1282_v32, %v1274_v47  ;;  %v1280_v15 = vadd.f32 %v1244_v48, %v1240_v25  ;;  %v96_v45 = vadd.f32 %v95_v42, %v94_v41 }
 0x1fe   :  { %v1285_v36 = vmul.f32 %v1281_v33, %v1273_v9  ;;  %v1279_v49 = vadd.f32 %v1243_v14, %v1239_v30 }
 0x1ff   :  { %v1284_v39 = vadd.f32 0.0009, %v1280_v15  ;;  %1861 = vrcp.f32 %v1286_v35  ;;  %v97_v29 = vrot.slane %v96_v45, 2 }
 0x200   :  { %v1283_v51 = vadd.f32 0.0009, %v1279_v49  ;;  %1863 = vrcp.f32 %v1285_v36 }
 0x201   :  { %v1288_v52 = vmul.f32 %v1284_v39, %v1276_v20  ;;  %v98_v47 = vadd.f32 %v97_v29, %v96_v45 }
 0x202   :  { %v1287_v21 = vmul.f32 %v1283_v51, %v1275_v50 }
 0x203   :  { %1865 = vrcp.f32 %v1288_v52  ;;  %v99_v32 = vrot.slane %v98_v47, 1 }
 0x204   :  { %1867 = vrcp.f32 %v1287_v21 }
 0x205   :  { %v100_v48 = vadd.f32 %v99_v32, %v98_v47 }
 0x206   :  { %v1720_v40 = vpop.f32.mrb[16].mxu1 }
 0x207   :  { %v1246_v54 = vsub.f32 %v1720_v40, %v1234_v31  ;;  %v1206_v55 = vpop.f32.mrb[17].mxu1  ;;  %1854 = vpush %v100_v48 }
 0x208   :  { %v1245_v43 = vsub.f32 %v1206_v55, %v1233_v1 }
 0x209   :  { %v1258_v56 = vmul.f32 2.0, %v1246_v54  ;;  %v1862_v31 = vpop.eup %1861 }
 0x20a   :  { %v1257_v57 = vmul.f32 2.0, %v1245_v43  ;;  %v1723_v27 = vpop.f32.mrb[18].mxu1  ;;  %v1864_v1 = vpop.eup %1863 }
 0x20b   :  { %v1262_v59 = vadd.f32 0.0009, %v1258_v56  ;;  %v1248_v60 = vsub.f32 %v1723_v27, %v1236_v8  ;;  %v1216_v61 = vpop.f32.mrb[19].mxu1 }
 0x20c   :  { %v1261_v63 = vadd.f32 0.0009, %v1257_v57  ;;  %v1247_v0 = vsub.f32 %v1216_v61, %v1235_v13 }
 0x20d   :  { %v1266_v2 = vmul.f32 %v1262_v59, %v1254_v44  ;;  %v1260_v3 = vmul.f32 2.0, %v1248_v60  ;;  %v1866_v19 = vpop.eup %1865 }
 0x20e   :  { %v1265_v4 = vmul.f32 %v1261_v63, %v1253_v62  ;;  %v1259_v5 = vmul.f32 2.0, %v1247_v0  ;;  %v1868_v23 = vpop.eup %1867 }
 0x20f   :  { %v1294_v10 = vmul.f32 %v1862_v31, %v1266_v2  ;;  %v1264_v11 = vadd.f32 0.0009, %v1260_v3 }
 0x210   :  { %v1293_v16 = vmul.f32 %v1864_v1, %v1265_v4  ;;  %v1263_v17 = vadd.f32 0.0009, %v1259_v5 }
 0x211   :  { %v1268_v18 = vmul.f32 %v1264_v11, %v1256_v6  ;;  %v1299_v8 = vsel %vm1297_vm5, %v1294_v10, 0.0 }
 0x212   :  { %v1267_v22 = vmul.f32 %v1263_v17, %v1255_v12  ;;  %v1298_v13 = vsel %vm1297_vm5, %v1293_v16, 0.0 }
 0x213   :  { %v1296_v24 = vmul.f32 %v1866_v19, %v1268_v18  ;;  %v1300_v25 = vadd.f32 %v1299_v8, %v1298_v13 }
 0x214   :  { %v1295_v28 = vmul.f32 %v1868_v23, %v1267_v22 }
 0x215   :  { %v1303_v7 = vsel %vm1297_vm5, %v1296_v24, 0.0 }
 0x216   :  { %v1301_v30 = vsel %vm1297_vm5, %v1295_v28, 0.0 }
 0x217   :  { %v1302_v34 = vadd.f32 %v1301_v30, %v1300_v25 }
 0x219   :  { %v1304_v37 = vadd.f32 %v1303_v7, %v1302_v34 }
 0x21b   :  { %1305 = vadd.xlane.f32.xlu0 %v1304_v37 }
 0x238   :  { %s1855_s1 = spop %1854 }
 0x239   :  { %103 = sst [smem:[#allocation2]] %s1855_s1 }
 0x2a8   :  { %v1306_v38 = vpop.xlane.xlu0 %1305 }
 0x2a9   :  { %v1307_v9 = vrot.slane %v1306_v38, 4 }
 0x2ab   :  { %v1308_v33 = vadd.f32 %v1307_v9, %v1306_v38 }
 0x2ad   :  { %v1309_v14 = vrot.slane %v1308_v33, 2 }
 0x2af   :  { %v1310_v35 = vadd.f32 %v1309_v14, %v1308_v33 }
 0x2b1   :  { %v1311_v15 = vrot.slane %v1310_v35, 1 }
 0x2b3   :  { %v1312_v36 = vadd.f32 %v1311_v15, %v1310_v35 }
 0x2b5   :  { %1856 = vpush %v1312_v36 }
 0x2e6   :  { %s1857_s28 = spop %1856 }
 0x2e7   :  { %1315 = sst [smem:[#allocation2 + $0x2]] %s1857_s28 }
 0x2e8   :  { %1878 = shalt.err (!%p1875_p2)
}
 0x2e9   :  { %s1883_s3 = smov [#allocation2]  }
 0x2ea   :  { %1323 = dma.smem_to_hbm %s1883_s3, 16, %s2287_s5, [#allocation3]  }
 0x2eb   :  { %1879 = dma.done.wait [#allocation3], 16  }
 0x2ec   :  { %1880 = vsyncadd [#allocation3], 4294967280 }
 0x2ed   :  { %1327 = sfence }
 0x2ee   :  { %1328 = vsyncpa [#allocation3], 1 }

</bundles_post_ra>
